<compile_context>
chip_gen: v5e
topology: v5e:2x2
jax: 0.10.0
libtpu: 0.0.40
codegen_flags: <defaults>
</compile_context>

<pallas_src>
import functools

import jax
import jax.numpy as jnp
from jax import lax
from jax.experimental import pallas as pl
from jax.experimental.pallas import tpu as pltpu


def _logsigmoid(x):
    # numerically stable: logsigmoid(x) = min(x, 0) - log(1 + exp(-|x|))
    return jnp.minimum(x, 0.0) - jnp.log(1.0 + jnp.exp(-jnp.abs(x)))


def _cbow_block_kernel(center_ref, tn_ref, vtab_ref, utab_t_ref, o_ref, *,
                       num_targets):
    # center_ref : (TB, C)       int32  context-word ids for this batch tile
    # tn_ref     : (TB, T + N)   int32  [target ids | negative ids]
    # vtab_ref   : (vocab, D)    f32    V embedding table (VMEM resident)
    # utab_t_ref : (D, vocab)    f32    U embedding table, pre-transposed
    # o_ref      : (1, 8, 128)   f32    per-block partial loss at [0, 0, 0]
    TB, C = center_ref.shape
    _, TN = tn_ref.shape
    vocab = vtab_ref.shape[0]
    T = num_targets

    inv_c = 1.0 / float(C)  # original module hardcodes /4 == 1/C for its window

    c_idx = center_ref[...]                                   # (TB, C)   int32
    tn_idx = tn_ref[...]                                      # (TB, TN)  int32

    # ---- fused gather #1: v_sum = sum_c V[center[b,c]] / C  via counts @ V ----
    ctx_iota = lax.broadcasted_iota(jnp.int32, (TB, C, vocab), 2)
    ctx_onehot = (c_idx[:, :, None] == ctx_iota).astype(jnp.float32)  # (TB,C,V)
    counts = jnp.sum(ctx_onehot, axis=1)                              # (TB, V)
    v_sum = jnp.dot(counts, vtab_ref[...],
                    preferred_element_type=jnp.float32) * inv_c       # (TB, D)

    # ---- fused gather #2: score every vocab word once, then select columns ----
    all_scores = jnp.dot(v_sum, utab_t_ref[...],
                         preferred_element_type=jnp.float32)          # (TB, V)
    tn_iota = lax.broadcasted_iota(jnp.int32, (TB, TN, vocab), 2)
    tn_onehot = (tn_idx[:, :, None] == tn_iota).astype(jnp.float32)   # (TB,TN,V)
    scores = jnp.sum(tn_onehot * all_scores[:, None, :], axis=-1)     # (TB, TN)

    # positives keep their sign, negatives use logsigmoid(-u.v)  (u_neg = -U(neg))
    col = lax.broadcasted_iota(jnp.int32, (1, TN), 1)
    is_pos = col < T
    sign = jnp.where(is_pos, 1.0, -1.0)
    # -mean(a + b) over (B, T): every negative term is counted T times.
    weight = jnp.where(is_pos, 1.0, float(T))
    ls = _logsigmoid(scores * sign)                                   # (TB, TN)
    partial = jnp.sum(ls * weight)                                    # scalar

    sub = lax.broadcasted_iota(jnp.int32, (1, 8, 128), 1)
    lane = lax.broadcasted_iota(jnp.int32, (1, 8, 128), 2)
    o_ref[...] = jnp.where((sub == 0) & (lane == 0), partial, 0.0)


def cbow_ns_loss(V_table, U_table, center_words, target_words, neg_words,
                 *, batch_tile=8):
    B, C = center_words.shape
    T = target_words.shape[1]
    N = neg_words.shape[1]
    vocab, D = V_table.shape

    TB = batch_tile if (B % batch_tile == 0) else B
    assert B % TB == 0, "batch must be divisible by the batch tile"
    num_blocks = B // TB

    # Glue: concatenate target/negative ids once, pre-transpose U once (XLA).
    center = center_words.astype(jnp.int32)
    tn_idx = jnp.concatenate(
        [target_words.astype(jnp.int32), neg_words.astype(jnp.int32)], axis=1)
    V_f = V_table.astype(jnp.float32)
    U_t = jnp.transpose(U_table.astype(jnp.float32))           # (D, vocab)

    kernel = functools.partial(_cbow_block_kernel, num_targets=T)

    partials = pl.pallas_call(
        kernel,
        out_shape=jax.ShapeDtypeStruct((num_blocks, 8, 128), jnp.float32),
        grid=(num_blocks,),
        in_specs=[
            pl.BlockSpec((TB, C), lambda i: (i, 0)),
            pl.BlockSpec((TB, T + N), lambda i: (i, 0)),
            pl.BlockSpec((vocab, D), lambda i: (0, 0)),    # table resident
            pl.BlockSpec((D, vocab), lambda i: (0, 0)),    # table resident
        ],
        out_specs=pl.BlockSpec((1, 8, 128), lambda i: (i, 0, 0)),
        compiler_params=pltpu.CompilerParams(
            dimension_semantics=("parallel",)),
    )(center, tn_idx, V_f, U_t)

    return -jnp.sum(partials) / (B * T)


def reference_loss(V_table, U_table, center_words, target_words, neg_words):
    # pure-JAX mirror of the PyTorch forward, for verification
    v = jnp.take(V_table, center_words, axis=0)                 # (B, C, D)
    u = jnp.take(U_table, target_words, axis=0)                 # (B, T, D)
    u_neg = -jnp.take(U_table, neg_words, axis=0)               # (B, N, D)
    v_sum = jnp.sum(v / 4.0, axis=1)[:, None, :]                # /4 == 1/C here
    pos = jnp.sum(u * v_sum, axis=-1)                           # (B, T)
    neg = jnp.sum(u_neg * v_sum, axis=-1)                       # (B, N)
    a = _logsigmoid(pos)
    b = jnp.sum(_logsigmoid(neg), axis=1, keepdims=True)
    return -jnp.mean(a + b)


if __name__ == "__main__":
    vocab = 128          # input_size
    D = 128              # projection_size (lane-dense)
    B, C, T, N = 16, 4, 3, 6   # batch, context window (=4 -> the /4), targets, negs

    key = jax.random.PRNGKey(0)
    kV, kU, kc, kt, kn = jax.random.split(key, 5)

    # The module's own init makes U all-zero (trivial constant loss); use
    # moderate random tables so the kernel math is exercised non-trivially.
    V_table = jax.random.uniform(kV, (vocab, D), jnp.float32,
                                 minval=-0.25, maxval=0.25)
    U_table = jax.random.uniform(kU, (vocab, D), jnp.float32,
                                 minval=-0.25, maxval=0.25)

    center_words = jax.random.randint(kc, (B, C), 0, vocab, jnp.int32)
    target_words = jax.random.randint(kt, (B, T), 0, vocab, jnp.int32)
    neg_words = jax.random.randint(kn, (B, N), 0, vocab, jnp.int32)

    loss = cbow_ns_loss(V_table, U_table, center_words, target_words, neg_words)
    jax.block_until_ready(loss)

    ref = reference_loss(V_table, U_table, center_words, target_words, neg_words)
    assert jnp.allclose(loss, ref, atol=1e-4, rtol=1e-4), (loss, ref)

    print("KERNEL_OK")
</pallas_src>

<mosaic_0001>
module attributes {stable_mosaic.version = 11 : i64} {
  func.func @_cbow_block_kernel(%arg0: i32, %arg1: memref<8x4xi32, #tpu.memory_space<vmem>>, %arg2: memref<8x9xi32, #tpu.memory_space<vmem>>, %arg3: memref<128x128xf32, #tpu.memory_space<vmem>>, %arg4: memref<128x128xf32, #tpu.memory_space<vmem>>, %arg5: memref<1x8x128xf32, #tpu.memory_space<vmem>>) attributes {dimension_semantics = [#tpu.dimension_semantics<parallel>], iteration_bounds = array<i64: 2>, scalar_prefetch = 0 : i64, scratch_operands = 0 : i64, tpu.core_type = #tpu.core_type<tc>, window_params = [{transform_indices = @transform_0, window_bounds = array<i64: 8, 4>}, {transform_indices = @transform_1, window_bounds = array<i64: 8, 9>}, {pipeline_mode = #tpu.pipeline_mode<synchronous>, transform_indices = @transform_2, window_bounds = array<i64: 128, 128>}, {pipeline_mode = #tpu.pipeline_mode<synchronous>, transform_indices = @transform_3, window_bounds = array<i64: 128, 128>}, {transform_indices = @transform_4, window_bounds = array<i64: 1, 8, 128>}]} {
    %c0 = arith.constant 0 : index
    %c0_0 = arith.constant 0 : index
    %0 = vector.load %arg1[%c0, %c0_0] : memref<8x4xi32, #tpu.memory_space<vmem>>, vector<8x4xi32>
    %c0_1 = arith.constant 0 : index
    %c0_2 = arith.constant 0 : index
    %1 = vector.load %arg2[%c0_1, %c0_2] : memref<8x9xi32, #tpu.memory_space<vmem>>, vector<8x9xi32>
    %2 = tpu.iota {dimensions = array<i32: 2>} : vector<8x4x128xi32>
    %3 = vector.shape_cast %0 : vector<8x4xi32> to vector<8x4x1xi32>
    %4 = vector.broadcast %3 : vector<8x4x1xi32> to vector<8x4x128xi32>
    %5 = arith.cmpi eq, %4, %2 : vector<8x4x128xi32>
    %6 = arith.extui %5 : vector<8x4x128xi1> to vector<8x4x128xi32>
    %7 = arith.sitofp %6 : vector<8x4x128xi32> to vector<8x4x128xf32>
    %cst = arith.constant dense<0.000000e+00> : vector<8x128xf32>
    %8 = vector.multi_reduction <add>, %7, %cst [1] : vector<8x4x128xf32> to vector<8x128xf32>
    %c0_3 = arith.constant 0 : index
    %c0_4 = arith.constant 0 : index
    %9 = vector.load %arg3[%c0_3, %c0_4] : memref<128x128xf32, #tpu.memory_space<vmem>>, vector<128x128xf32>
    %cst_5 = arith.constant dense<0.000000e+00> : vector<8x128xf32>
    %10 = tpu.matmul %8, %9, %cst_5 {dimension_numbers = #tpu.dot_dimension_numbers<[1], [0], [0], [1], [0, 0, 1, 1], [], []>} : vector<8x128xf32>, vector<128x128xf32>, vector<8x128xf32> -> vector<8x128xf32>
    %cst_6 = arith.constant 2.500000e-01 : f32
    %11 = vector.broadcast %cst_6 : f32 to vector<8x128xf32>
    %12 = arith.mulf %10, %11 : vector<8x128xf32>
    %c0_7 = arith.constant 0 : index
    %c0_8 = arith.constant 0 : index
    %13 = vector.load %arg4[%c0_7, %c0_8] : memref<128x128xf32, #tpu.memory_space<vmem>>, vector<128x128xf32>
    %cst_9 = arith.constant dense<0.000000e+00> : vector<8x128xf32>
    %14 = tpu.matmul %12, %13, %cst_9 {dimension_numbers = #tpu.dot_dimension_numbers<[1], [0], [0], [1], [0, 0, 1, 1], [], []>} : vector<8x128xf32>, vector<128x128xf32>, vector<8x128xf32> -> vector<8x128xf32>
    %15 = tpu.iota {dimensions = array<i32: 2>} : vector<8x9x128xi32>
    %16 = vector.shape_cast %1 : vector<8x9xi32> to vector<8x9x1xi32>
    %17 = vector.broadcast %16 : vector<8x9x1xi32> to vector<8x9x128xi32>
    %18 = arith.cmpi eq, %17, %15 : vector<8x9x128xi32>
    %19 = arith.extui %18 : vector<8x9x128xi1> to vector<8x9x128xi32>
    %20 = arith.sitofp %19 : vector<8x9x128xi32> to vector<8x9x128xf32>
    %21 = vector.shape_cast %14 : vector<8x128xf32> to vector<8x1x128xf32>
    %22 = vector.broadcast %21 : vector<8x1x128xf32> to vector<8x9x128xf32>
    %23 = arith.mulf %20, %22 : vector<8x9x128xf32>
    %cst_10 = arith.constant dense<0.000000e+00> : vector<8x9xf32>
    %24 = vector.multi_reduction <add>, %23, %cst_10 [2] : vector<8x9x128xf32> to vector<8x9xf32>
    %25 = tpu.iota {dimensions = array<i32: 1>} : vector<1x9xi32>
    %c3_i32 = arith.constant 3 : i32
    %26 = vector.broadcast %c3_i32 : i32 to vector<1x9xi32>
    %27 = arith.cmpi slt, %25, %26 : vector<1x9xi32>
    %cst_11 = arith.constant 1.000000e+00 : f32
    %cst_12 = arith.constant -1.000000e+00 : f32
    %28 = vector.broadcast %cst_11 : f32 to vector<1x9xf32>
    %29 = vector.broadcast %cst_12 : f32 to vector<1x9xf32>
    %30 = arith.select %27, %28, %29 : vector<1x9xi1>, vector<1x9xf32>
    %cst_13 = arith.constant 1.000000e+00 : f32
    %cst_14 = arith.constant 3.000000e+00 : f32
    %31 = vector.broadcast %cst_13 : f32 to vector<1x9xf32>
    %32 = vector.broadcast %cst_14 : f32 to vector<1x9xf32>
    %33 = arith.select %27, %31, %32 : vector<1x9xi1>, vector<1x9xf32>
    %34 = vector.broadcast %30 : vector<1x9xf32> to vector<8x9xf32>
    %35 = arith.mulf %24, %34 : vector<8x9xf32>
    %cst_15 = arith.constant 0.000000e+00 : f32
    %36 = vector.broadcast %cst_15 : f32 to vector<8x9xf32>
    %37 = arith.minimumf %35, %36 : vector<8x9xf32>
    %38 = math.absf %35 : vector<8x9xf32>
    %cst_16 = arith.constant 0.000000e+00 : f32
    %39 = vector.broadcast %cst_16 : f32 to vector<8x9xf32>
    %40 = arith.subf %39, %38 : vector<8x9xf32>
    %41 = math.exp %40 : vector<8x9xf32>
    %cst_17 = arith.constant 1.000000e+00 : f32
    %42 = vector.broadcast %cst_17 : f32 to vector<8x9xf32>
    %43 = arith.addf %42, %41 : vector<8x9xf32>
    %44 = math.log %43 : vector<8x9xf32>
    %45 = arith.subf %37, %44 : vector<8x9xf32>
    %46 = vector.broadcast %33 : vector<1x9xf32> to vector<8x9xf32>
    %47 = arith.mulf %45, %46 : vector<8x9xf32>
    %48 = vector.shape_cast %47 : vector<8x9xf32> to vector<1x8x9xf32>
    %cst_18 = arith.constant dense<0.000000e+00> : vector<1xf32>
    %49 = vector.multi_reduction <add>, %48, %cst_18 [1, 2] : vector<1x8x9xf32> to vector<1xf32>
    %50 = vector.shape_cast %49 : vector<1xf32> to vector<1x1x1xf32>
    %51 = vector.extract %50[0, 0, 0] : f32 from vector<1x1x1xf32>
    %52 = tpu.iota {dimensions = array<i32: 1>} : vector<1x8x128xi32>
    %53 = tpu.iota {dimensions = array<i32: 2>} : vector<1x8x128xi32>
    %c0_i32 = arith.constant 0 : i32
    %54 = vector.broadcast %c0_i32 : i32 to vector<1x8x128xi32>
    %55 = arith.cmpi eq, %52, %54 : vector<1x8x128xi32>
    %c0_i32_19 = arith.constant 0 : i32
    %56 = vector.broadcast %c0_i32_19 : i32 to vector<1x8x128xi32>
    %57 = arith.cmpi eq, %53, %56 : vector<1x8x128xi32>
    %58 = arith.andi %55, %57 : vector<1x8x128xi1>
    %cst_20 = arith.constant 0.000000e+00 : f32
    %59 = vector.broadcast %51 : f32 to vector<1x8x128xf32>
    %60 = vector.broadcast %cst_20 : f32 to vector<1x8x128xf32>
    %61 = arith.select %58, %59, %60 : vector<1x8x128xi1>, vector<1x8x128xf32>
    %c0_21 = arith.constant 0 : index
    %c0_22 = arith.constant 0 : index
    %c0_23 = arith.constant 0 : index
    %62 = vector.load %arg5[%c0_21, %c0_22, %c0_23] : memref<1x8x128xf32, #tpu.memory_space<vmem>>, vector<1x8x128xf32>
    tpu.vector_store %arg5[%c0_21, %c0_22, %c0_23], %61 {strides = array<i32>} : memref<1x8x128xf32, #tpu.memory_space<vmem>>, vector<1x8x128xf32>,
    return
  }
  func.func @transform_0(%arg0: i32) -> (i32, i32) {
    %c0_i32 = arith.constant 0 : i32
    %c0_i32_0 = arith.constant 0 : i32
    return %arg0, %c0_i32 : i32, i32
  }
  func.func @transform_1(%arg0: i32) -> (i32, i32) {
    %c0_i32 = arith.constant 0 : i32
    %c0_i32_0 = arith.constant 0 : i32
    return %arg0, %c0_i32 : i32, i32
  }
  func.func @transform_2(%arg0: i32) -> (i32, i32) {
    %c0_i32 = arith.constant 0 : i32
    %c0_i32_0 = arith.constant 0 : i32
    %c0_i32_1 = arith.constant 0 : i32
    return %c0_i32, %c0_i32_0 : i32, i32
  }
  func.func @transform_3(%arg0: i32) -> (i32, i32) {
    %c0_i32 = arith.constant 0 : i32
    %c0_i32_0 = arith.constant 0 : i32
    %c0_i32_1 = arith.constant 0 : i32
    return %c0_i32, %c0_i32_0 : i32, i32
  }
  func.func @transform_4(%arg0: i32) -> (i32, i32, i32) {
    %c0_i32 = arith.constant 0 : i32
    %c0_i32_0 = arith.constant 0 : i32
    %c0_i32_1 = arith.constant 0 : i32
    return %arg0, %c0_i32, %c0_i32_0 : i32, i32, i32
  }
}

</mosaic_0001>

<bundles_post_ra>
// kernel: tpu_custom_call.1
= control target key start
LH: loop header
LB: loop body
LE: loop exit
PB: predicated region body
PF: predicated region fallthrough
CT: control target
= control target key end

     0   :  { %9 = vsyncpa [#allocation3], 0  ;;  %s1861_s0 = inlined_call_operand.vmem [shape: s32[16,4], index: 0, kind: input, shape index: {}]   ;;  %s1862_s1 = inlined_call_operand.vmem [shape: s32[16,9], index: 1, kind: input, shape index: {}]   ;;  %s1863_s2 = inlined_call_operand.hbm [shape: f32[128,128], index: 2, kind: input, shape index: {}]   ;;  %s1864_s3 = inlined_call_operand.hbm [shape: f32[128,128], index: 3, kind: input, shape index: {}]   ;;  %s1865_s4 = inlined_call_operand.hbm [shape: f32[2,8,128], index: 4, kind: output, shape index: {}]  }
   0x1   :  { %10 = vsyncpa [#allocation6], 0 }
   0x2   :  { %11 = vsyncpa [#allocation4], 0 }
   0x3   :  { %13 = vsyncpa [#allocation4 + $0x1], 0  ;;  %s1498_s15 = smov 0   ;;  %s1500_s16 = smov 0  }
   0x4   :  { %s1502_s17 = smov 0   ;;  %s1504_s18 = smov 0  }
   0x5 LB: > { %s1519_s19 = sadd.s32 4294967295, %s1463_s18   ;;  %s1149_s20 = sadd.s32 4294967294, %s1463_s18   ;;  %s1463_s18 = sphi %s1504_s18, %s1872_s18   ;;  %s1459_s17 = sphi %s1502_s17, %s1871_s17   ;;  %s1455_s16 = sphi %s1500_s16, %s1870_s16   ;;  %s1451_s15 = sphi %s1498_s15, %s1869_s15  }
   0x6   : > { %s1523_s21 = sadd.s32 1, %s1463_s18   ;;  %s120_s22 = sadd.s32 1, %s1459_s17 }
   0x7   : > { %s117_s23 = ssub.s32 %s1463_s18, %s1523_s21  ;;  %p130_p0 = scmp.ne.s32.totalorder %s1459_s17, %s1455_s16 }
   0x8   : > { %p118_p1 = scmp.eq.s32.totalorder %s117_s23, 0  ;;  %p131_p2 = scmp.eq.s32.totalorder %s1519_s19, 1 }
   0x9   : > { %p136_p3 = scmp.ne.s32.totalorder %s1455_s16, %s1451_s15  ;;  %p137_p4 = scmp.eq.s32.totalorder %s1149_s20, 1 }
   0xa   : > { %s1534_s24 = scalar_select %p118_p1, %s1459_s17, %s120_s22  }
   0xb   : > { %p1536_p5 = por %p131_p2, %p130_p0  ;;  %p1540_p6 = por %p137_p4, %p136_p3 }
   0xc   : > { %p1150_p7 = scmp.ge.s32.totalorder %s1463_s18, 1  ;;  %p144_p8 = scmp.lt.s32.totalorder %s1463_s18, 3 }
   0xd   : > { %p1211_p9 = scmp.eq.s32.totalorder %s1519_s19, 0  ;;  %s155_s30 = sshll.u32 %s1863_s2, 4  ;;  %s156_s30 = int_to_ptr.hbm [resolvable:$true] %s155_s30 }
   0xe   : > { %p1547_p10 = pnand %p1150_p7, %p144_p8  ;;  %s1465_s5 = smov [#allocation2]  }
   0xf   : > { %s157_s6 = sshll.u32 %s1465_s5, 4  ;;  %s169_s9 = sshll.u32 %s1864_s3, 4  ;;  %s158_s6 = int_to_ptr.vmem [resolvable:$true] %s157_s6  ;;  %s170_s9 = int_to_ptr.hbm [resolvable:$true] %s169_s9 }
  0x10   : > { %p1200_p11 = pneg %p1547_p10  ;;  %s1466_s10 = smov 128  }
  0x11   : > { %s1467_s11 = smov 8   ;;  %s1468_s12 = smov [#allocation5]  }
  0x12   : > { %p1201_p12 = pnand %p1211_p9, %p1200_p11  ;;  %s171_s13 = sshll.u32 %s1468_s12, 4  ;;  %s172_s13 = int_to_ptr.vmem [resolvable:$true] %s171_s13 }
  0x13   : > { %201 = sbr.rel (%p1547_p10) target bundleno = 1026 (0x402), region = 36 }
  0x14   : > { %1203 = dma.hbm_to_vmem [thread:$0]  (!%p1201_p12), %s156_s30, 2048, %s158_s6, [#allocation3], %s1466_s10, %s1466_s10, %s1467_s11  }
  0x15   : > { %1206 = dma.hbm_to_vmem [thread:$0]  (!%p1201_p12), %s170_s9, 2048, %s172_s13, [#allocation6], %s1466_s10, %s1466_s10, %s1467_s11  }
  0x18   : > { %1438 = dma.done.wait (%p1211_p9), [#allocation3], 2048  }
  0x19   : > { %1440 = vsyncadd (%p1211_p9), [#allocation3], 4294965248 }
  0x1a   : > { %1442 = dma.done.wait (%p1211_p9), [#allocation6], 2048  }
  0x1b   : > { %1444 = vsyncadd (%p1211_p9), [#allocation6], 4294965248  ;;  %v246_v0 = vlaneseq  ;;  %p236_p13 = scmp.lt.s32.totalorder %s1519_s19, 1  ;;  %v400_v16 = vld [vmem:[#allocation2 + $0x78] sm:$0xff]  ;;  %v399_v17 = vld [vmem:[#allocation2 + $0x70] sm:$0xff]  ;;  %vm328_vm1 = vcmask 1043456  }
  0x1c   : > { %424 = vmatpush.msra.mxu0 %v400_v16  ;;  %v398_v18 = vld [vmem:[#allocation2 + $0x68] sm:$0xff]  ;;  %v397_v19 = vld [vmem:[#allocation2 + $0x60] sm:$0xff]  ;;  %v396_v20 = vld [vmem:[#allocation2 + $0x58] sm:$0xff]  ;;  %v1469_v33 = vmov 0.0   ;;  %vm409_vm9 = vcmask 1041409   ;;  %vm411_vm10 = vcmask 1042434  }
  0x1d   : > { %v1572_v1 = vshrl.u32 %v246_v0, 7  ;;  %s237_s14 = scalar_select %p236_p13, %s1519_s19, 1  ;;  %v395_v21 = vld [vmem:[#allocation2 + $0x50] sm:$0xff]  ;;  %v394_v22 = vld [vmem:[#allocation2 + $0x48] sm:$0xff]  ;;  %v393_v23 = vld [vmem:[#allocation2 + $0x40] sm:$0xff]  ;;  %v1598_v28 = vand.u32 127, %v246_v0 }
  0x1e   : > { %425 = vmatpush.msra.mxu0 %v399_v17  ;;  %v392_v24 = vld [vmem:[#allocation2 + $0x38] sm:$0xff]  ;;  %v391_v26 = vld [vmem:[#allocation2 + $0x30] sm:$0xff]  ;;  %v390_v27 = vld [vmem:[#allocation2 + $0x28] sm:$0xff]  ;;  %vm413_vm11 = vcmask 1043459   ;;  %vm415_vm12 = vcmask 1044484   ;;  %vm417_vm13 = vcmask 1045509  }
  0x1f   : > { %1257 = vset.pattern.permute.xlu1 %v1572_v1  ;;  %1256 = vset.pattern.permute.xlu0 %v1572_v1  ;;  %s1158_s20 = sshll.u32 %s237_s14, 3  ;;  %v389_v29 = vld [vmem:[#allocation2 + $0x20] sm:$0xff]  ;;  %v388_v30 = vld [vmem:[#allocation2 + $0x18] sm:$0xff]  ;;  %v387_v31 = vld [vmem:[#allocation2 + $0x10] sm:$0xff]  ;;  %v1619_v63 = vadd.s32 8, %v1572_v1  ;;  %vm419_vm14 = vcmask 1046534  }
  0x20   : > { %s239_s27 = scalar_lea.vmem %s1861_s0, %s1158_s20  ;;  %1258 = vset.pattern.permute.xlu2 %v1572_v1  ;;  %s243_s30 = scalar_lea.vmem %s1862_s1, %s1158_s20  ;;  %426 = vmatpush.msra.mxu0 %v398_v18  ;;  %v386_v32 = vld [vmem:[#allocation2 + $0x8] sm:$0xff]  ;;  %v385_v38 = vld [vmem:[#allocation2] sm:$0xff]  ;;  %v460_v58 = vld [vmem:[#allocation5 + $0x78] sm:$0xff]  ;;  %vm421_vm15 = vcmask 1047559  }
  0x21   : > { %v244_v2 = vld [vmem:[%s239_s27] sm:$0xff]  ;;  %v459_v59 = vld [vmem:[#allocation5 + $0x70] sm:$0xff]  ;;  %461 = vmatpush.msra.mxu1 %v460_v58  ;;  %s233_s5 = sand.u32 1, %s1455_s16   ;;  %s1185_s7 = sshll.u32 %s1519_s19, 3 }
  0x22   : > { %v262_v3 = vperm.slane %v244_v2, 2  ;;  %v248_v4 = vperm.slane %v244_v2, 0  ;;  %v276_v5 = vperm.slane %v244_v2, 4  ;;  %v269_v6 = vperm.slane %v244_v2, 3  ;;  %v1584_v11 = vld [vmem:[%s243_s30] sm:$0xff]  ;;  %427 = vmatpush.msra.mxu0 %v397_v19  ;;  %v451_v58 = vld [vmem:[#allocation5 + $0x30] sm:$0xff]  ;;  %s1051_s10 = scalar_lea.hbm %s1865_s4, %s1185_s7 }
  0x23   : > { %v255_v7 = vperm.slane %v244_v2, 1  ;;  %v283_v8 = vperm.slane %v244_v2, 5  ;;  %v297_v9 = vperm.slane %v244_v2, 7  ;;  %v290_v10 = vperm.slane %v244_v2, 6  ;;  %462 = vmatpush.msra.mxu1 %v459_v59  ;;  %s1157_s6 = sshll.u32 %s233_s5, 3  ;;  %s1055_s13 = sshll.u32 %s1051_s10, 4  ;;  %s1056_s13 = int_to_ptr.hbm [resolvable:$true] %s1055_s13 }
  0x24   : > { %v481_v12 = vperm.slane %v1584_v11, 0  ;;  %v494_v13 = vperm.slane %v1584_v11, 1  ;;  %v507_v14 = vperm.slane %v1584_v11, 2  ;;  %v520_v15 = vperm.slane %v1584_v11, 3  ;;  %428 = vmatpush.msra.mxu0 %v396_v20  ;;  %s235_s11 = scalar_lea.vmem [#allocation7], %s1157_s6  ;;  %s1041_s19 = scalar_lea.sflag [#allocation4], %s233_s5 }
  0x25   : > { %v559_v59 = vperm.slane %v1584_v11, 6  ;;  %s1053_s12 = sshll.u32 %s235_s11, 4  ;;  %s1407_s20 = sshra.s32 %s1056_s13, 4  ;;  %s1054_s12 = int_to_ptr.vmem [resolvable:$true] %s1053_s12  ;;  %s1408_s20 = int_to_ptr.hbm [resolvable:$true] %s1407_s20 }
  0x26   : > { %429 = vmatpush.msra.mxu0 %v395_v21  ;;  %s1409_s22 = scalar_lea.hbm %s1408_s20, 8  ;;  %s1413_s28 = scalar_lea.hbm %s1865_s4, 16 }
  0x27   : > { %267 = vperm.xlu1 %1257, %v262_v3   ;;  %253 = vperm.xlu0 %1256, %v248_v4   ;;  %p1410_p0 = scmp.ne.s32.totalorder %s1408_s20, %s1409_s22  ;;  %p1414_p3 = scmp.lt.s32.totalorder %s1408_s20, %s1865_s4 }
  0x28   : > { %281 = vperm.xlu2 %1258, %v276_v5   ;;  %430 = vmatpush.msra.mxu0 %v394_v22  ;;  %v458_v5 = vld [vmem:[#allocation5 + $0x68] sm:$0xff]  ;;  %v456_v22 = vld [vmem:[#allocation5 + $0x58] sm:$0xff]  ;;  %p1415_p4 = scmp.lt.s32.totalorder %s1413_s28, %s1409_s22 }
  0x29   : > { %463 = vmatpush.msra.mxu1 %v458_v5  ;;  %p1411_p1 = pnand %p1410_p0, %p1536_p5 }
  0x2a   : > { %431 = vmatpush.msra.mxu0 %v393_v23  ;;  %p1416_p7 = por %p1415_p4, %p1414_p3 }
  0x2b   : > { %p1412_p2 = pneg %p1411_p1 }
  0x2c   : > { %432 = vmatpush.msra.mxu0 %v392_v24  ;;  %v546_v24 = vperm.slane %v1584_v11, 5 }
  0x2d   : > { %p1417_p8 = pnand %p1416_p7, %p1412_p2 }
  0x2e   : > { %433 = vmatpush.msra.mxu0 %v391_v26 }
  0x2f   : > { %274 = vperm.xlu1 %1257, %v269_v6   ;;  %260 = vperm.xlu0 %1256, %v255_v7  }
  0x30   : > { %288 = vperm.xlu2 %1258, %v283_v8   ;;  %434 = vmatpush.msra.mxu0 %v390_v27 }
  0x32   : > { %435 = vmatpush.msra.mxu0 %v389_v29 }
  0x34   : > { %436 = vmatpush.msra.mxu0 %v388_v30  ;;  %v455_v30 = vld [vmem:[#allocation5 + $0x50] sm:$0xff] }
  0x36   : > { %437 = vmatpush.msra.mxu0 %v387_v31 }
  0x37   : > { %302 = vperm.xlu1 %1257, %v297_v9   ;;  %295 = vperm.xlu0 %1256, %v290_v10   ;;  %v457_v9 = vld [vmem:[#allocation5 + $0x60] sm:$0xff] }
  0x38   : > { %486 = vperm.xlu2 %1258, %v481_v12   ;;  %438 = vmatpush.msra.mxu0 %v386_v32 }
  0x39   : > { %464 = vmatpush.msra.mxu1 %v457_v9  ;;  %v572_v9 = vperm.slane %v1584_v11, 7 }
  0x3a   : > { %439 = vmatpush.msra.mxu0 %v385_v38 }
  0x3b   : > { %465 = vmatpush.msra.mxu1 %v456_v22 }
  0x3d   : > { %466 = vmatpush.msra.mxu1 %v455_v30 }
  0x3f   : > { %499 = vperm.xlu1 %1257, %v494_v13   ;;  %1259 = vset.pattern.permute.xlu0 %v1619_v63 }
  0x40   : > { %1260 = vset.pattern.permute.xlu2 %v1619_v63 }
  0x47   : > { %512 = vperm.xlu1 %1257, %v507_v14   ;;  %492 = vperm.xlu0 %1259, %v481_v12  }
  0x48   : > { %505 = vperm.xlu2 %1260, %v494_v13  }
  0x4f   : > { %525 = vperm.xlu1 %1257, %v520_v15   ;;  %531 = vperm.xlu0 %1259, %v520_v15   ;;  %v447_v15 = vld [vmem:[#allocation5 + $0x10] sm:$0xff] }
  0x50   : > { %518 = vperm.xlu2 %1260, %v507_v14   ;;  %v1470_v14 = vmov -1.0  }
  0x57   : > { %1261 = vset.pattern.permute.xlu1 %v1619_v63  ;;  %583 = vperm.xlu0 %1259, %v572_v9  }
  0x5f   : > { %557 = vperm.xlu1 %1261, %v546_v24  }
  0x67   : > { %570 = vperm.xlu1 %1261, %v559_v59  }
  0x6f   : > { %1263 = vset.pattern.permute.xlu1 %v1572_v1 }
  0x77   : > { %577 = vperm.xlu1 %1263, %v572_v9  }
  0x7f   : > { %1265 = vset.pattern.permute.xlu1 %v1619_v63 }
  0x82   : > { %v282_v25 = vpop.permute.xlu2 %281 }
  0x83   : > { %vm308_vm0 = vcmp.eq.s32.totalorder %v282_v25, %v1598_v28 }
  0x84   : > { %v1164_v34 = vsel %vm308_vm0, 1.0, %v1469_v33  ;;  %vm714_vm0 = vcmp.lt.s32.totalorder %v1598_v28, 3 }
  0x85   : > { %v357_v39 = vsel %vm328_vm1, %v1164_v34, 0.0 }
  0x86   : > { %v358_v45 = vrot.slane %v357_v39, 4 }
  0x88   : > { %v359_v51 = vadd.f32 %v358_v45, %v357_v39  ;;  %v454_v39 = vld [vmem:[#allocation5 + $0x48] sm:$0xff] }
  0x89   : > { %467 = vmatpush.msra.mxu1 %v454_v39 }
  0x8a   : > { %v289_v35 = vpop.permute.xlu2 %288  ;;  %v360_v0 = vrot.slane %v359_v51, 2 }
  0x8b   : > { %vm309_vm2 = vcmp.eq.s32.totalorder %v289_v35, %v1598_v28 }
  0x8c   : > { %v1165_v40 = vsel %vm309_vm2, 1.0, %v1469_v33  ;;  %v361_v16 = vadd.f32 %v360_v0, %v359_v51  ;;  %v452_v51 = vld [vmem:[#allocation5 + $0x38] sm:$0xff] }
  0x8d   : > { %v364_v48 = vsel %vm328_vm1, %v1165_v40, 0.0 }
  0x8e   : > { %v365_v52 = vrot.slane %v364_v48, 4  ;;  %v362_v40 = vrot.slane %v361_v16, 1 }
  0x90   : > { %v366_v2 = vadd.f32 %v365_v52, %v364_v48  ;;  %v363_v52 = vadd.f32 %v362_v40, %v361_v16  ;;  %v715_v16 = vsel %vm714_vm0, 1.0, %v1470_v14 }
  0x91   : > { %728 = vperm.xlu0 %1259, %v715_v16  }
  0x92   : > { %v367_v17 = vrot.slane %v366_v2, 2  ;;  %v487_v22 = vpop.permute.xlu2 %486 }
  0x99   : > { %v268_v36 = vpop.permute.xlu1 %267  ;;  %v254_v37 = vpop.permute.xlu0 %253  ;;  %1264 = vset.pattern.permute.xlu0 %v1572_v1 }
  0x9a   : > { %vm306_vm3 = vcmp.eq.s32.totalorder %v268_v36, %v1598_v28  ;;  %vm304_vm4 = vcmp.eq.s32.totalorder %v254_v37, %v1598_v28 }
  0x9b   : > { %v1162_v41 = vsel %vm306_vm3, 1.0, %v1469_v33  ;;  %v1160_v42 = vsel %vm304_vm4, 1.0, %v1469_v33 }
  0x9c   : > { %v343_v43 = vsel %vm328_vm1, %v1162_v41, 0.0  ;;  %v329_v44 = vsel %vm328_vm1, %v1160_v42, 0.0  ;;  %v368_v41 = vadd.f32 %v367_v17, %v366_v2  ;;  %v445_v17 = vld [vmem:[#allocation5] sm:$0xff] }
  0x9d   : > { %v344_v46 = vrot.slane %v343_v43, 4  ;;  %v330_v47 = vrot.slane %v329_v44, 4 }
  0x9f   : > { %v331_v49 = vadd.f32 %v330_v47, %v329_v44  ;;  %v345_v50 = vadd.f32 %v344_v46, %v343_v43  ;;  %v453_v46 = vld [vmem:[#allocation5 + $0x40] sm:$0xff] }
  0xa0   : > { %468 = vmatpush.msra.mxu1 %v453_v46 }
  0xa1   : > { %v275_v53 = vpop.permute.xlu1 %274  ;;  %v261_v54 = vpop.permute.xlu0 %260  ;;  %v332_v55 = vrot.slane %v331_v49, 2  ;;  %v346_v60 = vrot.slane %v345_v50, 2 }
  0xa2   : > { %vm307_vm5 = vcmp.eq.s32.totalorder %v275_v53, %v1598_v28  ;;  %vm305_vm6 = vcmp.eq.s32.totalorder %v261_v54, %v1598_v28  ;;  %v369_v53 = vrot.slane %v368_v41, 1  ;;  %469 = vmatpush.msra.mxu1 %v452_v51 }
  0xa3   : > { %v1163_v56 = vsel %vm307_vm5, 1.0, %v1469_v33  ;;  %v1161_v57 = vsel %vm305_vm6, 1.0, %v1469_v33  ;;  %v333_v6 = vadd.f32 %v332_v55, %v331_v49  ;;  %v347_v10 = vadd.f32 %v346_v60, %v345_v50 }
  0xa4   : > { %v350_v61 = vsel %vm328_vm1, %v1163_v56, 0.0  ;;  %v336_v62 = vsel %vm328_vm1, %v1161_v57, 0.0  ;;  %v370_v0 = vadd.f32 %v369_v53, %v368_v41  ;;  %470 = vmatpush.msra.mxu1 %v451_v58  ;;  %vm675_vm6 = vcmask 1040384  }
  0xa5   : > { %v351_v3 = vrot.slane %v350_v61, 4  ;;  %v337_v4 = vrot.slane %v336_v62, 4  ;;  %v334_v23 = vrot.slane %v333_v6, 1  ;;  %v348_v31 = vrot.slane %v347_v10, 1 }
  0xa7   : > { %v352_v7 = vadd.f32 %v351_v3, %v350_v61  ;;  %v338_v8 = vadd.f32 %v337_v4, %v336_v62  ;;  %v335_v42 = vadd.f32 %v334_v23, %v333_v6  ;;  %v349_v47 = vadd.f32 %v348_v31, %v347_v10  ;;  %v450_v62 = vld [vmem:[#allocation5 + $0x28] sm:$0xff]  ;;  %v449_v4 = vld [vmem:[#allocation5 + $0x20] sm:$0xff] }
  0xa8   : > { %471 = vmatpush.msra.mxu1 %v450_v62  ;;  %v446_v10 = vld [vmem:[#allocation5 + $0x8] sm:$0xff] }
  0xa9   : > { %v353_v18 = vrot.slane %v352_v7, 2  ;;  %v339_v19 = vrot.slane %v338_v8, 2  ;;  %v303_v20 = vpop.permute.xlu1 %302  ;;  %v296_v21 = vpop.permute.xlu0 %295 }
  0xaa   : > { %vm311_vm7 = vcmp.eq.s32.totalorder %v303_v20, %v1598_v28  ;;  %vm310_vm8 = vcmp.eq.s32.totalorder %v296_v21, %v1598_v28  ;;  %472 = vmatpush.msra.mxu1 %v449_v4 }
  0xab   : > { %v354_v25 = vadd.f32 %v353_v18, %v352_v7  ;;  %v340_v26 = vadd.f32 %v339_v19, %v338_v8  ;;  %v1167_v27 = vsel %vm311_vm7, 1.0, %v1469_v33  ;;  %v1166_v29 = vsel %vm310_vm8, 1.0, %v1469_v33  ;;  %v448_v7 = vld [vmem:[#allocation5 + $0x18] sm:$0xff] }
  0xac   : > { %v378_v32 = vsel %vm328_vm1, %v1167_v27, 0.0  ;;  %v371_v34 = vsel %vm328_vm1, %v1166_v29, 0.0  ;;  %473 = vmatpush.msra.mxu1 %v448_v7  ;;  %v533_v18 = vperm.slane %v1584_v11, 4  ;;  %vm585_vm1 = vcmp.eq.s32.totalorder %v487_v22, %v1598_v28 }
  0xad   : > { %v355_v35 = vrot.slane %v354_v25, 1  ;;  %v341_v36 = vrot.slane %v340_v26, 1  ;;  %v379_v37 = vrot.slane %v378_v32, 4  ;;  %v372_v38 = vrot.slane %v371_v34, 4 }
  0xae   : > { %474 = vmatpush.msra.mxu1 %v447_v15  ;;  %544 = vperm.xlu2 %1260, %v533_v18  }
  0xaf   : > { %v342_v43 = vadd.f32 %v341_v36, %v340_v26  ;;  %v380_v44 = vadd.f32 %v379_v37, %v378_v32  ;;  %v373_v45 = vadd.f32 %v372_v38, %v371_v34  ;;  %v356_v48 = vadd.f32 %v355_v35, %v354_v25  ;;  %538 = vperm.xlu0 %1264, %v533_v18   ;;  %v1660_v25 = vpop.permute.xlu2 %505 }
  0xb0   : > { %475 = vmatpush.msra.mxu1 %v446_v10 }
  0xb1   : > { %v410_v49 = vsel %vm409_vm9, %v342_v43, %v335_v42  ;;  %v381_v50 = vrot.slane %v380_v44, 2  ;;  %v374_v12 = vrot.slane %v373_v45, 2  ;;  %v500_v21 = vpop.permute.xlu1 %499 }
  0xb2   : > { %v412_v54 = vsel %vm411_vm10, %v349_v47, %v410_v49  ;;  %476 = vmatpush.msra.mxu1 %v445_v17  ;;  %vm587_vm2 = vcmp.eq.s32.totalorder %v500_v21, %v1598_v28 }
  0xb3   : > { %v382_v55 = vadd.f32 %v381_v50, %v380_v44  ;;  %v375_v56 = vadd.f32 %v374_v12, %v373_v45  ;;  %v414_v57 = vsel %vm413_vm11, %v356_v48, %v412_v54  ;;  %v1170_v32 = vsel %vm587_vm2, 1.0, %v1469_v33 }
  0xb4   : > { %v416_v61 = vsel %vm415_vm12, %v363_v52, %v414_v57 }
  0xb5   : > { %v376_v13 = vrot.slane %v375_v56, 1  ;;  %v383_v60 = vrot.slane %v382_v55, 1  ;;  %v418_v5 = vsel %vm417_vm13, %v370_v0, %v416_v61 }
  0xb6   : > { %1262 = vset.pattern.permute.xlu2 %v1572_v1 }
  0xb7   : > { %v377_v2 = vadd.f32 %v376_v13, %v375_v56  ;;  %v384_v3 = vadd.f32 %v383_v60, %v382_v55  ;;  %v1664_v29 = vpop.permute.xlu2 %518 }
  0xb9   : > { %v420_v6 = vsel %vm419_vm14, %v377_v2, %v418_v5  ;;  %v513_v23 = vpop.permute.xlu1 %512  ;;  %v493_v63 = vpop.permute.xlu0 %492 }
  0xba   : > { %v422_v8 = vsel %vm421_vm15, %v384_v3, %v420_v6  ;;  %vm586_vm3 = vcmp.eq.s32.totalorder %v493_v63, %v1598_v28 }
  0xbb   : > { %440 = vmatmul.f32.vlgmr.msra.gmra.mxu0 %v422_v8  ;;  %v1169_v34 = vsel %vm586_vm3, 1.0, %v1469_v33 }
  0xbe   : > { %551 = vperm.xlu2 %1262, %v546_v24   ;;  %v1168_v24 = vsel %vm585_vm1, 1.0, %v1469_v33  ;;  %vm589_vm1 = vcmp.eq.s32.totalorder %v513_v23, %v1598_v28 }
  0xbf   : > { %v1172_v0 = vsel %vm589_vm1, 1.0, %v1469_v33  ;;  %vm590_vm1 = vcmp.eq.s32.totalorder %v1664_v29, %v1598_v28 }
  0xc1   : > { %v526_v26 = vpop.permute.xlu1 %525  ;;  %v1662_v27 = vpop.permute.xlu0 %531 }
  0xc2   : > { %vm591_vm2 = vcmp.eq.s32.totalorder %v526_v26, %v1598_v28  ;;  %v1471_v26 = vmov 3.0  }
  0xc3   : > { %v1174_v5 = vsel %vm591_vm2, 1.0, %v1469_v33  ;;  %vm592_vm2 = vcmp.eq.s32.totalorder %v1662_v27, %v1598_v28 }
  0xc6   : > { %564 = vperm.xlu2 %1262, %v559_v59  }
  0xc9   : > { %v584_v31 = vpop.permute.xlu0 %583 }
  0xca   : > { %vm600_vm7 = vcmp.eq.s32.totalorder %v584_v31, %v1598_v28 }
  0xcb   : > { %v1183_v57 = vsel %vm600_vm7, 1.0, %v1469_v33 }
  0xce   : > { %722 = vperm.xlu2 %1262, %v715_v16  }
  0xd1   : > { %v558_v30 = vpop.permute.xlu1 %557 }
  0xd2   : > { %vm596_vm4 = vcmp.eq.s32.totalorder %v558_v30, %v1598_v28 }
  0xd3   : > { %v1179_v12 = vsel %vm596_vm4, 1.0, %v1469_v33 }
  0xd9   : > { %v571_v35 = vpop.permute.xlu1 %570 }
  0xda   : > { %vm598_vm5 = vcmp.eq.s32.totalorder %v571_v35, %v1598_v28 }
  0xdb   : > { %v1181_v51 = vsel %vm598_vm5, 1.0, %v1469_v33  ;;  %vm588_vm5 = vcmp.eq.s32.totalorder %v1660_v25, %v1598_v28  ;;  %v716_v25 = vsel %vm714_vm0, 1.0, %v1471_v26  ;;  %vm990_vm0 = vcmask 130112  }
  0xe9   : > { %v578_v22 = vpop.permute.xlu1 %577 }
 0x103   : > { %v1674_v43 = vpop.permute.xlu0 %728 }
 0x108   : > { %v545_v11 = vpop.permute.xlu2 %544 }
 0x109   : > { %vm594_vm8 = vcmp.eq.s32.totalorder %v545_v11, %v1598_v28  ;;  %v1173_v11 = vsel %vm590_vm1, 1.0, %v1469_v33 }
 0x10a   : > { %v1177_v60 = vsel %vm594_vm8, 1.0, %v1469_v33  ;;  %vm599_vm8 = vcmp.eq.s32.totalorder %v578_v22, %v1598_v28 }
 0x10b   : > { %v1182_v30 = vsel %vm599_vm8, 1.0, %v1469_v33 }
 0x118   : > { %v552_v61 = vpop.permute.xlu2 %551 }
 0x119   : > { %vm595_vm3 = vcmp.eq.s32.totalorder %v552_v61, %v1598_v28 }
 0x11a   : > { %v1178_v10 = vsel %vm595_vm3, 1.0, %v1469_v33 }
 0x120   : > { %v565_v16 = vpop.permute.xlu2 %564 }
 0x121   : > { %v539_v6 = vpop.permute.xlu0 %538  ;;  %vm597_vm7 = vcmp.eq.s32.totalorder %v565_v16, %v1598_v28 }
 0x122   : > { %vm593_vm4 = vcmp.eq.s32.totalorder %v539_v6, %v1598_v28  ;;  %v1180_v21 = vsel %vm597_vm7, 1.0, %v1469_v33 }
 0x123   : > { %v1176_v14 = vsel %vm593_vm4, 1.0, %v1469_v33 }
 0x138   : > { %v441_v19 = vpop.f32.mrf.mxu0 }
 0x139   : > { %v444_v20 = vmul.f32 0.25, %v441_v19  ;;  %v1171_v19 = vsel %vm588_vm5, 1.0, %v1469_v33 }
 0x13b   : > { %477 = vmatmul.f32.vlgmr.msra.gmra.mxu1 %v444_v20 }
 0x1b8   : > { %v478_v36 = vpop.f32.mrf.mxu1 }
 0x1b9   : > { %v641_v37 = vperm.slane %v478_v36, 0  ;;  %v634_v38 = vrot.slane %v478_v36, 1  ;;  %v635_v39 = vrot.slane %v478_v36, 2  ;;  %v637_v40 = vrot.slane %v478_v36, 4 }
 0x1ba   : > { %v638_v41 = vrot.slane %v478_v36, 5  ;;  %v639_v42 = vrot.slane %v478_v36, 6  ;;  %v640_v47 = vrot.slane %v478_v36, 7  ;;  %v636_v48 = vrot.slane %v478_v36, 3 }
 0x1bb   : > { %v657_v44 = vmul.f32 %v1168_v24, %v641_v37  ;;  %v658_v45 = vmul.f32 %v1169_v34, %v641_v37  ;;  %v642_v46 = vperm.slane %v634_v38, 0  ;;  %v645_v54 = vperm.slane %v637_v40, 0  ;;  %v1723_v37 = vpop.permute.xlu2 %722 }
 0x1bc   : > { %v646_v49 = vperm.slane %v638_v41, 0  ;;  %v647_v50 = vperm.slane %v639_v42, 0  ;;  %v643_v55 = vperm.slane %v635_v39, 0  ;;  %v648_v56 = vperm.slane %v640_v47, 0 }
 0x1bd   : > { %673 = vadd.xlane.f32.xlu2 %v657_v44  ;;  %v676_v52 = vsel %vm675_vm6, %v658_v45, 0.0  ;;  %v659_v53 = vmul.f32 %v1170_v32, %v642_v46  ;;  %v644_v58 = vperm.slane %v636_v48, 0  ;;  %v666_v2 = vmul.f32 %v1177_v60, %v645_v54 }
 0x1be   : > { %677 = vadd.xlane.f32.xlu1 %v676_v52  ;;  %v668_v59 = vmul.f32 %v1179_v12, %v646_v49  ;;  %v670_v13 = vmul.f32 %v1181_v51, %v647_v50  ;;  %v672_v62 = vmul.f32 %v1183_v57, %v648_v56  ;;  %v661_v7 = vmul.f32 %v1172_v0, %v643_v55 }
 0x1bf   : > { %679 = vadd.xlane.f32.xlu0 %v659_v53  ;;  %v663_v9 = vmul.f32 %v1174_v5, %v644_v58  ;;  %v696_v15 = vsel %vm675_vm6, %v666_v2, 0.0  ;;  %v667_v17 = vmul.f32 %v1178_v10, %v646_v49  ;;  %v665_v18 = vmul.f32 %v1176_v14, %v645_v54 }
 0x1c0   : > { %v701_v3 = vsel %vm675_vm6, %v668_v59, 0.0  ;;  %v1694_v4 = vsel %vm675_vm6, %v670_v13, 0.0  ;;  %v1698_v8 = vsel %vm675_vm6, %v672_v62, 0.0  ;;  %v660_v20 = vmul.f32 %v1171_v19, %v642_v46 }
 0x1c1   : > { %v669_v63 = vmul.f32 %v1180_v21, %v647_v50  ;;  %v671_v31 = vmul.f32 %v1182_v30, %v648_v56  ;;  %v662_v24 = vmul.f32 %v1173_v11, %v643_v55  ;;  %v1175_v34 = vsel %vm592_vm2, 1.0, %v1469_v33 }
 0x1c2   : > { %v681_v23 = vsel %vm675_vm6, %v660_v20, 0.0  ;;  %v664_v35 = vmul.f32 %v1175_v34, %v644_v58  ;;  %v1472_v42 = vmov 0  }
 0x1c3   : > { %v686_v32 = vsel %vm675_vm6, %v662_v24, 0.0  ;;  %1266 = vset.pattern.permute.xlu2 %v1472_v42 }
 0x1c4   : > { %v691_v36 = vsel %vm675_vm6, %v664_v35, 0.0 }
 0x1c5   : > { %684 = vadd.xlane.f32.xlu2 %v661_v7 }
 0x1c6   : > { %689 = vadd.xlane.f32.xlu1 %v663_v9 }
 0x1c7   : > { %697 = vadd.xlane.f32.xlu0 %v696_v15 }
 0x1cd   : > { %699 = vadd.xlane.f32.xlu2 %v667_v17 }
 0x1ce   : > { %694 = vadd.xlane.f32.xlu1 %v665_v18 }
 0x1d5   : > { %682 = vadd.xlane.f32.xlu2 %v681_v23 }
 0x1d6   : > { %704 = vadd.xlane.f32.xlu1 %v669_v63 }
 0x1db   : > { %897 = vperm.xlu0 %1264, %v716_v25  }
 0x1de   : > { %709 = vadd.xlane.f32.xlu1 %v671_v31 }
 0x1e3   : > { %1268 = vset.pattern.permute.xlu0 %v1472_v42 }
 0x1e6   : > { %687 = vadd.xlane.f32.xlu1 %v686_v32 }
 0x1ee   : > { %692 = vadd.xlane.f32.xlu1 %v691_v36 }
 0x207   : > { %903 = vperm.xlu1 %1265, %v716_v25  }
 0x20f   : > { %1267 = vset.pattern.permute.xlu1 %v1472_v42 }
 0x230   : > { %v674_v29 = vpop.xlane.xlu2 %673 }
 0x231   : > { %v732_v38 = vmul.f32 %v1723_v37, %v674_v29  ;;  %v678_v39 = vpop.xlane.xlu1 %677  ;;  %702 = vadd.xlane.f32.xlu1 %v701_v3 }
 0x232   : > { %v680_v40 = vpop.xlane.xlu0 %679 }
 0x233   : > { %v764_v41 = vand.u32 2147483647, %v732_v38  ;;  %v1727_v27 = vmul.f32 %v1723_v37, %v680_v40  ;;  %v748_v3 = vmin.f32 %v732_v38, 0.0 }
 0x235   : > { %v780_v33 = vsub.f32 0.0, %v764_v41  ;;  %v766_v44 = vand.u32 2147483647, %v1727_v27  ;;  %v750_v63 = vmin.f32 %v1727_v27, 0.0 }
 0x237   : > { %v796_v45 = vmul.f32 1.442695, %v780_v33  ;;  %v782_v46 = vsub.f32 0.0, %v766_v44 }
 0x238   : > { %v685_v47 = vpop.xlane.xlu2 %684 }
 0x239   : > { %1269 = vpow2.f32 %v796_v45  ;;  %v800_v48 = vmul.f32 1.442695, %v782_v46  ;;  %v1731_v49 = vmul.f32 %v1723_v37, %v685_v47  ;;  %v690_v50 = vpop.xlane.xlu1 %689  ;;  %707 = vadd.xlane.f32.xlu1 %v1694_v4 }
 0x23a   : > { %v698_v60 = vpop.xlane.xlu0 %697  ;;  %v1753_v30 = vmul.f32 %v1723_v37, %v690_v50 }
 0x23b   : > { %1271 = vpow2.f32 %v800_v48  ;;  %v768_v12 = vand.u32 2147483647, %v1731_v49  ;;  %v1758_v29 = vmul.f32 %v1674_v43, %v698_v60  ;;  %v752_v41 = vmin.f32 %v1731_v49, 0.0 }
 0x23c   : > { %v770_v32 = vand.u32 2147483647, %v1753_v30 }
 0x23d   : > { %v784_v51 = vsub.f32 0.0, %v768_v12  ;;  %v773_v50 = vand.u32 2147483647, %v1758_v29 }
 0x23e   : > { %v786_v33 = vsub.f32 0.0, %v770_v32 }
 0x23f   : > { %v1270_v52 = vpop.eup %1269  ;;  %v804_v53 = vmul.f32 1.442695, %v784_v51 }
 0x240   : > { %v828_v54 = vadd.f32 1.0, %v1270_v52  ;;  %v700_v55 = vpop.xlane.xlu2 %699  ;;  %v808_v51 = vmul.f32 1.442695, %v786_v33 }
 0x241   : > { %v1272_v56 = vpop.eup %1271  ;;  %1273 = vpow2.f32 %v804_v53  ;;  %v742_v57 = vmul.f32 %v1723_v37, %v700_v55  ;;  %712 = vadd.xlane.f32.xlu1 %v1698_v8  ;;  %v695_v58 = vpop.xlane.xlu1 %694  ;;  %v1741_v8 = vmul.f32 %v1674_v43, %v678_v39 }
 0x242   : > { %1275 = vlog2.f32 %v828_v54  ;;  %v830_v59 = vadd.f32 1.0, %v1272_v56  ;;  %v1765_v46 = vmul.f32 %v1723_v37, %v695_v58  ;;  %v789_v56 = vsub.f32 0.0, %v773_v50 }
 0x243   : > { %v774_v13 = vand.u32 2147483647, %v742_v57  ;;  %v765_v18 = vand.u32 2147483647, %v1741_v8  ;;  %v758_v38 = vmin.f32 %v742_v57, 0.0 }
 0x244   : > { %1277 = vlog2.f32 %v830_v59  ;;  %v772_v52 = vand.u32 2147483647, %v1765_v46 }
 0x245   : > { %v790_v61 = vsub.f32 0.0, %v774_v13  ;;  %v781_v25 = vsub.f32 0.0, %v765_v18 }
 0x246   : > { %v788_v60 = vsub.f32 0.0, %v772_v52 }
 0x247   : > { %v1274_v62 = vpop.eup %1273  ;;  %v816_v0 = vmul.f32 1.442695, %v790_v61  ;;  %v798_v24 = vmul.f32 1.442695, %v781_v25 }
 0x248   : > { %v1276_v2 = vpop.eup %1275  ;;  %v832_v9 = vadd.f32 1.0, %v1274_v62  ;;  %v683_v58 = vpop.xlane.xlu2 %682  ;;  %v814_v62 = vmul.f32 1.442695, %v789_v56 }
 0x249   : > { %v845_v4 = vmul.f32 0.6931472, %v1276_v2  ;;  %1279 = vpow2.f32 %v816_v0  ;;  %v705_v5 = vpop.xlane.xlu1 %704 }
 0x24a   : > { %v1738_v6 = vmul.f32 %v1723_v37, %v705_v5  ;;  %v1278_v15 = vpop.eup %1277  ;;  %1281 = vlog2.f32 %v832_v9  ;;  %v812_v9 = vmul.f32 1.442695, %v788_v60 }
 0x24b   : > { %v876_v7 = vsub.f32 %v748_v3, %v845_v4  ;;  %v849_v20 = vmul.f32 0.6931472, %v1278_v15  ;;  %v1775_v3 = vmul.f32 %v1674_v43, %v683_v58 }
 0x24c   : > { %v776_v10 = vand.u32 2147483647, %v1738_v6  ;;  %v760_v0 = vmin.f32 %v1738_v6, 0.0 }
 0x24d   : > { %v1744_v14 = vpop.permute.xlu0 %897  ;;  %v878_v31 = vsub.f32 %v750_v63, %v849_v20  ;;  %v767_v18 = vand.u32 2147483647, %v1775_v3 }
 0x24e   : > { %v907_v16 = vmul.f32 %v1744_v14, %v876_v7  ;;  %v792_v19 = vsub.f32 0.0, %v776_v10 }
 0x24f   : > { %v1280_v17 = vpop.eup %1279  ;;  %v909_v36 = vmul.f32 %v1744_v14, %v878_v31  ;;  %v783_v20 = vsub.f32 0.0, %v767_v18 }
 0x250   : > { %v838_v21 = vadd.f32 1.0, %v1280_v17  ;;  %940 = vperm.xlu2 %1266, %v907_v16   ;;  %v820_v22 = vmul.f32 1.442695, %v792_v19  ;;  %v1282_v11 = vpop.eup %1281 }
 0x251   : > { %v710_v23 = vpop.xlane.xlu1 %709  ;;  %v853_v35 = vmul.f32 0.6931472, %v1282_v11  ;;  %v802_v31 = vmul.f32 1.442695, %v783_v20 }
 0x252   : > { %1283 = vlog2.f32 %v838_v21  ;;  %v1750_v26 = vmul.f32 %v1723_v37, %v710_v23 }
 0x253   : > { %1285 = vpow2.f32 %v820_v22  ;;  %v880_v45 = vsub.f32 %v752_v41, %v853_v35 }
 0x254   : > { %1287 = vpow2.f32 %v798_v24 }
 0x255   : > { %v911_v54 = vmul.f32 %v1744_v14, %v880_v45 }
 0x258   : > { %v1284_v34 = vpop.eup %1283 }
 0x259   : > { %v865_v39 = vmul.f32 0.6931472, %v1284_v34  ;;  %v688_v40 = vpop.xlane.xlu1 %687  ;;  %v1286_v42 = vpop.eup %1285 }
 0x25a   : > { %v1762_v27 = vmul.f32 %v1674_v43, %v688_v40  ;;  %946 = vperm.xlu1 %1267, %v909_v36   ;;  %v840_v47 = vadd.f32 1.0, %v1286_v42  ;;  %v1288_v55 = vpop.eup %1287  ;;  %v749_v36 = vmin.f32 %v1741_v8, 0.0  ;;  %v754_v8 = vmin.f32 %v1753_v30, 0.0 }
 0x25b   : > { %v886_v44 = vsub.f32 %v758_v38, %v865_v39  ;;  %v829_v13 = vadd.f32 1.0, %v1288_v55  ;;  %v757_v55 = vmin.f32 %v1758_v29, 0.0  ;;  %v756_v30 = vmin.f32 %v1765_v46, 0.0 }
 0x25c   : > { %v769_v48 = vand.u32 2147483647, %v1762_v27  ;;  %1289 = vlog2.f32 %v840_v47  ;;  %v753_v38 = vmin.f32 %v1762_v27, 0.0 }
 0x25d   : > { %v917_v12 = vmul.f32 %v1744_v14, %v886_v44 }
 0x25e   : > { %v785_v49 = vsub.f32 0.0, %v769_v48 }
 0x25f   : > { %970 = vperm.xlu0 %1268, %v917_v12  }
 0x260   : > { %v806_v53 = vmul.f32 1.442695, %v785_v49 }
 0x261   : > { %v693_v37 = vpop.xlane.xlu1 %692 }
 0x262   : > { %1291 = vpow2.f32 %v806_v53  ;;  %v739_v57 = vmul.f32 %v1674_v43, %v693_v37  ;;  %952 = vperm.xlu1 %1267, %v911_v54   ;;  %v1290_v59 = vpop.eup %1289 }
 0x263   : > { %1293 = vpow2.f32 %v808_v51  ;;  %v869_v2 = vmul.f32 0.6931472, %v1290_v59 }
 0x264   : > { %v771_v61 = vand.u32 2147483647, %v739_v57  ;;  %1295 = vlog2.f32 %v829_v13  ;;  %v755_v44 = vmin.f32 %v739_v57, 0.0 }
 0x265   : > { %v888_v5 = vsub.f32 %v760_v0, %v869_v2  ;;  %1297 = vpow2.f32 %v814_v62  ;;  %v751_v62 = vmin.f32 %v1775_v3, 0.0  ;;  %v778_v2 = vand.u32 2147483647, %v1750_v26 }
 0x266   : > { %v787_v4 = vsub.f32 0.0, %v771_v61 }
 0x267   : > { %v919_v17 = vmul.f32 %v1744_v14, %v888_v5 }
 0x268   : > { %v1292_v7 = vpop.eup %1291  ;;  %v810_v15 = vmul.f32 1.442695, %v787_v4  ;;  %v794_v4 = vsub.f32 0.0, %v778_v2 }
 0x269   : > { %v1294_v10 = vpop.eup %1293  ;;  %v833_v16 = vadd.f32 1.0, %v1292_v7 }
 0x26a   : > { %1299 = vpow2.f32 %v810_v15  ;;  %976 = vperm.xlu1 %1267, %v919_v17   ;;  %v834_v6 = vadd.f32 1.0, %v1294_v10  ;;  %v1296_v19 = vpop.eup %1295  ;;  %v824_v7 = vmul.f32 1.442695, %v794_v4 }
 0x26b   : > { %1301 = vlog2.f32 %v833_v16  ;;  %v1298_v21 = vpop.eup %1297  ;;  %v847_v24 = vmul.f32 0.6931472, %v1296_v19 }
 0x26c   : > { %1303 = vpow2.f32 %v812_v9  ;;  %v837_v11 = vadd.f32 1.0, %v1298_v21 }
 0x26d   : > { %1305 = vlog2.f32 %v834_v6  ;;  %v877_v39 = vsub.f32 %v749_v36, %v847_v24 }
 0x270   : > { %v1300_v22 = vpop.eup %1299 }
 0x271   : > { %v1302_v23 = vpop.eup %1301  ;;  %v835_v63 = vadd.f32 1.0, %v1300_v22 }
 0x272   : > { %v1304_v25 = vpop.eup %1303  ;;  %v855_v32 = vmul.f32 0.6931472, %v1302_v23 }
 0x273   : > { %1307 = vlog2.f32 %v835_v63  ;;  %v836_v34 = vadd.f32 1.0, %v1304_v25  ;;  %v1306_v35 = vpop.eup %1305 }
 0x274   : > { %1309 = vpow2.f32 %v802_v31  ;;  %v881_v40 = vsub.f32 %v753_v38, %v855_v32  ;;  %v857_v42 = vmul.f32 0.6931472, %v1306_v35 }
 0x275   : > { %1311 = vlog2.f32 %v837_v11 }
 0x276   : > { %1313 = vlog2.f32 %v836_v34  ;;  %v882_v49 = vsub.f32 %v754_v8, %v857_v42 }
 0x278   : > { %v913_v37 = vmul.f32 %v1744_v14, %v882_v49 }
 0x279   : > { %v1308_v41 = vpop.eup %1307  ;;  %v1781_v33 = vpop.permute.xlu1 %903 }
 0x27a   : > { %v859_v45 = vmul.f32 0.6931472, %v1308_v41  ;;  %v912_v47 = vmul.f32 %v1781_v33, %v881_v40  ;;  %v908_v48 = vmul.f32 %v1781_v33, %v877_v39  ;;  %v1310_v50 = vpop.eup %1309 }
 0x27b   : > { %v1312_v27 = vpop.eup %1311  ;;  %v831_v53 = vadd.f32 1.0, %v1310_v50 }
 0x27c   : > { %v883_v12 = vsub.f32 %v755_v44, %v859_v45  ;;  %955 = vperm.xlu0 %1268, %v912_v47   ;;  %943 = vperm.xlu2 %1266, %v908_v48   ;;  %v1314_v52 = vpop.eup %1313  ;;  %v863_v54 = vmul.f32 0.6931472, %v1312_v27 }
 0x27d   : > { %v861_v56 = vmul.f32 0.6931472, %v1314_v52  ;;  %1315 = vlog2.f32 %v831_v53 }
 0x27e   : > { %v914_v51 = vmul.f32 %v1781_v33, %v883_v12  ;;  %v885_v57 = vsub.f32 %v757_v55, %v863_v54  ;;  %1317 = vpow2.f32 %v824_v7 }
 0x27f   : > { %v884_v58 = vsub.f32 %v756_v30, %v861_v56 }
 0x280   : > { %961 = vperm.xlu1 %1267, %v914_v51   ;;  %v916_v59 = vmul.f32 %v1781_v33, %v885_v57 }
 0x281   : > { %v915_v60 = vmul.f32 %v1744_v14, %v884_v58 }
 0x283   : > { %v1316_v13 = vpop.eup %1315 }
 0x284   : > { %958 = vperm.xlu2 %1266, %v913_v37   ;;  %v851_v61 = vmul.f32 0.6931472, %v1316_v13  ;;  %v1318_v18 = vpop.eup %1317 }
 0x285   : > { %v842_v21 = vadd.f32 1.0, %v1318_v18 }
 0x286   : > { %v879_v29 = vsub.f32 %v751_v62, %v851_v61  ;;  %v988_v61 = vadd.s32 4294967288, %v1598_v28 }
 0x288   : > { %967 = vperm.xlu1 %1267, %v916_v59   ;;  %v910_v0 = vmul.f32 %v1781_v33, %v879_v29 }
 0x28c   : > { %964 = vperm.xlu2 %1266, %v915_v60  }
 0x294   : > { %949 = vperm.xlu2 %1266, %v910_v0  }
 0x2a4   : > { %v703_v46 = vpop.xlane.xlu1 %702 }
 0x2a5   : > { %v743_v5 = vmul.f32 %v1674_v43, %v703_v46 }
 0x2a7   : > { %v775_v9 = vand.u32 2147483647, %v743_v5  ;;  %v759_v35 = vmin.f32 %v743_v5, 0.0 }
 0x2a9   : > { %v791_v15 = vsub.f32 0.0, %v775_v9 }
 0x2aa   : > { %v941_v54 = vpop.permute.xlu2 %940 }
 0x2ab   : > { %v818_v10 = vmul.f32 1.442695, %v791_v15  ;;  %v987_v46 = vperm.slane %v941_v54, %v1598_v28 }
 0x2ac   : > { %v708_v16 = vpop.xlane.xlu1 %707 }
 0x2ad   : > { %1319 = vpow2.f32 %v818_v10  ;;  %v745_v17 = vmul.f32 %v1674_v43, %v708_v16 }
 0x2af   : > { %v777_v3 = vand.u32 2147483647, %v745_v17  ;;  %v761_v48 = vmin.f32 %v745_v17, 0.0 }
 0x2b1   : > { %v793_v6 = vsub.f32 0.0, %v777_v3 }
 0x2b3   : > { %v1320_v19 = vpop.eup %1319  ;;  %v822_v20 = vmul.f32 1.442695, %v793_v6 }
 0x2b4   : > { %v839_v22 = vadd.f32 1.0, %v1320_v19  ;;  %v713_v23 = vpop.xlane.xlu1 %712 }
 0x2b5   : > { %1321 = vpow2.f32 %v822_v20  ;;  %v747_v63 = vmul.f32 %v1674_v43, %v713_v23  ;;  %v762_v43 = vmin.f32 %v1750_v26, 0.0 }
 0x2b6   : > { %1323 = vlog2.f32 %v839_v22 }
 0x2b7   : > { %v779_v25 = vand.u32 2147483647, %v747_v63  ;;  %1325 = vlog2.f32 %v842_v21  ;;  %v763_v51 = vmin.f32 %v747_v63, 0.0 }
 0x2b9   : > { %v795_v31 = vsub.f32 0.0, %v779_v25 }
 0x2bb   : > { %v1322_v11 = vpop.eup %1321  ;;  %v826_v24 = vmul.f32 1.442695, %v795_v31 }
 0x2bc   : > { %v1324_v32 = vpop.eup %1323  ;;  %v841_v34 = vadd.f32 1.0, %v1322_v11 }
 0x2bd   : > { %v867_v36 = vmul.f32 0.6931472, %v1324_v32  ;;  %1327 = vpow2.f32 %v826_v24  ;;  %v1326_v38 = vpop.eup %1325 }
 0x2be   : > { %1329 = vlog2.f32 %v841_v34  ;;  %v873_v40 = vmul.f32 0.6931472, %v1326_v38 }
 0x2bf   : > { %v887_v39 = vsub.f32 %v759_v35, %v867_v36 }
 0x2c0   : > { %v890_v47 = vsub.f32 %v762_v43, %v873_v40 }
 0x2c1   : > { %v918_v41 = vmul.f32 %v1781_v33, %v887_v39 }
 0x2c2   : > { %v921_v27 = vmul.f32 %v1744_v14, %v890_v47 }
 0x2c3   : > { %v1328_v42 = vpop.eup %1327  ;;  %973 = vperm.xlu2 %1266, %v918_v41  }
 0x2c4   : > { %v1330_v44 = vpop.eup %1329  ;;  %v843_v45 = vadd.f32 1.0, %v1328_v42 }
 0x2c5   : > { %v871_v50 = vmul.f32 0.6931472, %v1330_v44 }
 0x2c6   : > { %1331 = vlog2.f32 %v843_v45 }
 0x2c7   : > { %v889_v8 = vsub.f32 %v761_v48, %v871_v50 }
 0x2c9   : > { %v920_v12 = vmul.f32 %v1781_v33, %v889_v8 }
 0x2cb   : > { %979 = vperm.xlu0 %1268, %v920_v12   ;;  %982 = vperm.xlu2 %1266, %v921_v27  }
 0x2cc   : > { %v1332_v49 = vpop.eup %1331  ;;  %v947_v56 = vpop.permute.xlu1 %946 }
 0x2cd   : > { %v875_v52 = vmul.f32 0.6931472, %v1332_v49  ;;  %v992_v0 = vperm.slane %v947_v56, %v1598_v28 }
 0x2cf   : > { %v891_v53 = vsub.f32 %v763_v51, %v875_v52 }
 0x2d1   : > { %v922_v26 = vmul.f32 %v1781_v33, %v891_v53  ;;  %v971_v59 = vpop.permute.xlu0 %970 }
 0x2d2   : > { %v1004_v21 = vperm.slane %v971_v59, %v1598_v28 }
 0x2d3   : > { %985 = vperm.xlu1 %1267, %v922_v26  }
 0x2d4   : > { %v953_v57 = vpop.permute.xlu1 %952 }
 0x2d5   : > { %v995_v15 = vperm.slane %v953_v57, %v1598_v28 }
 0x2d6   : > { %v944_v55 = vpop.permute.xlu2 %943 }
 0x2d7   : > { %v989_v2 = vperm.slane %v944_v55, %v988_v61 }
 0x2d9   : > { %v991_v16 = vsel %vm990_vm0, %v989_v2, %v987_v46 }
 0x2dc   : > { %v977_v58 = vpop.permute.xlu1 %976 }
 0x2dd   : > { %v1007_v23 = vperm.slane %v977_v58, %v1598_v28 }
 0x2de   : > { %v959_v37 = vpop.permute.xlu2 %958 }
 0x2df   : > { %v998_v17 = vperm.slane %v959_v37, %v1598_v28 }
 0x2e6   : > { %v965_v30 = vpop.permute.xlu2 %964 }
 0x2e7   : > { %v1001_v18 = vperm.slane %v965_v30, %v1598_v28 }
 0x2ee   : > { %v950_v13 = vpop.permute.xlu2 %949  ;;  %v956_v14 = vpop.permute.xlu0 %955 }
 0x2ef   : > { %v993_v29 = vperm.slane %v950_v13, %v988_v61  ;;  %v996_v4 = vperm.slane %v956_v14, %v988_v61 }
 0x2f1   : > { %v994_v5 = vsel %vm990_vm0, %v993_v29, %v992_v0  ;;  %v997_v6 = vsel %vm990_vm0, %v996_v4, %v995_v15 }
 0x2f2   : > { %v962_v60 = vpop.permute.xlu1 %961  ;;  %v1013_v19 = vsel %vm409_vm9, %v994_v5, %v991_v16  ;;  %vm1021_vm9 = vcmask 72704  }
 0x2f3   : > { %v999_v7 = vperm.slane %v962_v60, %v988_v61  ;;  %v1014_v31 = vsel %vm411_vm10, %v997_v6, %v1013_v19  ;;  %vm1034_vm10 = vcmp.eq.s32.totalorder %v1572_v1, 0 }
 0x2f5   : > { %v1000_v22 = vsel %vm990_vm0, %v999_v7, %v998_v17 }
 0x2f6   : > { %v1015_v24 = vsel %vm413_vm11, %v1000_v22, %v1014_v31  ;;  %vm1035_vm11 = vcmp.eq.s32.totalorder %v1598_v28, 0 }
 0x2fa   : > { %v968_v33 = vpop.permute.xlu1 %967 }
 0x2fb   : > { %v1002_v10 = vperm.slane %v968_v33, %v988_v61 }
 0x2fd   : > { %v1003_v63 = vsel %vm990_vm0, %v1002_v10, %v1001_v18 }
 0x2fe   : > { %v1016_v35 = vsel %vm415_vm12, %v1003_v63, %v1015_v24  ;;  %vm1036_vm12 = vmand %vm1034_vm10, %vm1035_vm11 }
 0x31d   : > { %v974_v62 = vpop.permute.xlu2 %973 }
 0x31e   : > { %v1005_v3 = vperm.slane %v974_v62, %v988_v61 }
 0x320   : > { %v1006_v11 = vsel %vm990_vm0, %v1005_v3, %v1004_v21 }
 0x321   : > { %v1017_v39 = vsel %vm417_vm13, %v1006_v11, %v1016_v35 }
 0x325   : > { %v983_v25 = vpop.permute.xlu2 %982 }
 0x326   : > { %v1010_v36 = vperm.slane %v983_v25, %v1598_v28 }
 0x33d   : > { %v980_v9 = vpop.permute.xlu0 %979 }
 0x33e   : > { %v1008_v20 = vperm.slane %v980_v9, %v988_v61 }
 0x340   : > { %v1009_v32 = vsel %vm990_vm0, %v1008_v20, %v1007_v23 }
 0x341   : > { %v1018_v41 = vsel %vm419_vm14, %v1009_v32, %v1017_v39 }
 0x345   : > { %v986_v34 = vpop.permute.xlu1 %985 }
 0x346   : > { %v1011_v38 = vperm.slane %v986_v34, %v988_v61 }
 0x348   : > { %v1012_v40 = vsel %vm990_vm0, %v1011_v38, %v1010_v36 }
 0x349   : > { %v1019_v42 = vsel %vm421_vm15, %v1012_v40, %v1018_v41 }
 0x34a   : > { %v1022_v43 = vsel %vm1021_vm9, %v1019_v42, 0.0 }
 0x34b   : > { %1023 = vadd.xlane.f32.xlu0 %v1022_v43 }
 0x3be   : > { %v1024_v44 = vpop.xlane.xlu0 %1023 }
 0x3bf   : > { %v1025_v45 = vrot.slane %v1024_v44, 4 }
 0x3c1   : > { %v1026_v47 = vadd.f32 %v1025_v45, %v1024_v44 }
 0x3c3   : > { %v1027_v48 = vrot.slane %v1026_v47, 2 }
 0x3c5   : > { %v1028_v50 = vadd.f32 %v1027_v48, %v1026_v47 }
 0x3c7   : > { %v1029_v8 = vrot.slane %v1028_v50, 1 }
 0x3c9   : > { %v1030_v12 = vadd.f32 %v1029_v8, %v1028_v50 }
 0x3cb   : > { %1188 = vpush %v1030_v12 }
 0x3fc   : > { %s1189_s14 = spop %1188 }
 0x3fd   : > { %v1037_v27 = vstv %s1189_s14 }
 0x3fe   : > { %v1038_v49 = vsel %vm1036_vm12, %v1037_v27, 0.0 }
 0x3ff   : > { %1039 = vst [vmem:[%s235_s11] sm:$0xff] %v1038_v49 }
 0x400   : > { %1420 = shalt.err (!%p1417_p8)
}
 0x401   : > { %1198 = dma.vmem_to_hbm [thread:$0]  (%p1536_p5), %s1054_s12, 128, %s1056_s13, %s1041_s19  }
 0x402 PF: > { %p1215_p9 = scmp.ge.s32.totalorder %s1463_s18, 2  ;;  %s1067_s5 = sand.u32 1, %s1451_s15  }
 0x403   : > { %s1068_s6 = scalar_lea.sflag [#allocation4], %s1067_s5 }
 0x404   : > { %p1208_p10 = pnand %p1215_p9, %p1540_p6 }
 0x406   : > { %p1209_p11 = pneg %p1208_p10 }
 0x408   : > { %1446 = dma.done.wait (%p1209_p11), %s1068_s6, 128  }
 0x409   : > { %1448 = vsyncadd (%p1209_p11), %s1068_s6, 4294967168  ;;  %p16_p12 = scmp.ge.s32.totalorder %s1523_s21, 4   ;;  %s1869_s15 = smov %s1455_s16 }
 0x40a   : > { %s1870_s16 = smov %s1459_s17  ;;  %s1871_s17 = smov %s1534_s24 }
 0x40b   : > { %s1872_s18 = smov %s1523_s21  ;;  %18 = sbr.rel (!%p16_p12) target bundleno = 5 (0x5), region = 83 }
 0x410   :  { %1074 = vsyncpa [#allocation3], 1 }
 0x411   :  { %1076 = vsyncpa [#allocation3 + $0x1], 1 }
 0x412   :  { %1077 = vsyncpa [#allocation6], 1 }
 0x413   :  { %1078 = vsyncpa [#allocation4], 1 }
 0x414   :  { %1080 = vsyncpa [#allocation4 + $0x1], 1 }

</bundles_post_ra>
